<compile_context>
chip_gen: v6e
topology: v6e:2x2x1
jax: 0.10.0
libtpu: 0.0.40
codegen_flags: <defaults>
</compile_context>

<pallas_src>
import jax
import jax.numpy as jnp
from jax import lax
from jax.experimental import pallas as pl
from jax.experimental.pallas import tpu as pltpu


def _conv1d_gemm_kernel(x_ref, w_ref, b_ref, o_ref):
    """One (row, col) tile of the im2col GEMM: o = x @ w + bias."""
    acc = jnp.dot(x_ref[...], w_ref[...], preferred_element_type=jnp.float32)
    o_ref[...] = (acc + b_ref[...].astype(jnp.float32)).astype(o_ref.dtype)


def downsample1d(x, weight, bias, *, tile_m=512, tile_n=256):
    """Pallas equivalent of Downsample1d.forward (Conv1d(dim, dim, 3, 2, 1)).

    x:      [B, C, L]   (PyTorch NCL layout)
    weight: [C, C, 3]   (PyTorch Conv1d [C_out, C_in, K])
    bias:   [C]
    returns [B, C, L_out],  L_out = (L + 2*1 - 3)//2 + 1
    """
    B, C, L = x.shape
    C_out, C_in, K = weight.shape
    assert C_in == C and C_out == C and K == 3, "Downsample1d uses Conv1d(dim, dim, 3, 2, 1)"
    stride, pad = 2, 1
    L_out = (L + 2 * pad - K) // stride + 1

    # ---- wrapper-side layout plumbing (im2col, lane-dense contraction dim) ----
    x_cl = jnp.transpose(x, (0, 2, 1))                        # [B, L, C]
    x_pad = jnp.pad(x_cl, ((0, 0), (pad, pad), (0, 0)))       # [B, L+2, C]
    taps = [
        lax.slice_in_dim(x_pad, k, k + stride * (L_out - 1) + 1, stride=stride, axis=1)
        for k in range(K)
    ]                                                         # K x [B, L_out, C]
    xcol = jnp.concatenate(taps, axis=-1).reshape(B * L_out, K * C)    # [M, 3C]
    w_mat = jnp.transpose(weight, (2, 1, 0)).reshape(K * C, C)         # [3C, C]
    b_row = bias.reshape(1, C)

    M, K3, N = B * L_out, K * C, C

    # ---- pad output channels to a multiple of 128 (unmasked lane-dense stores) ----
    N_pad = N if N % 128 == 0 else pl.cdiv(N, 128) * 128
    if N_pad != N:
        w_mat = jnp.pad(w_mat, ((0, 0), (0, N_pad - N)))
        b_row = jnp.pad(b_row, ((0, 0), (0, N_pad - N)))

    # ---- row tiling; pad M so every block is full-size ----
    if M <= tile_m:
        tm, M_pad = M, M            # single block == full dim (no (8,128) constraint)
    else:
        tm = tile_m                 # multiple of 8 by construction
        M_pad = pl.cdiv(M, tm) * tm
        if M_pad != M:
            xcol = jnp.pad(xcol, ((0, M_pad - M), (0, 0)))

    # ---- column tiling (only matters for large dim; keeps weight block in VMEM) ----
    if N_pad <= tile_n:
        tn = N_pad
    elif N_pad % tile_n == 0:
        tn = tile_n
    else:
        tn = 128                    # N_pad is a multiple of 128, so this always divides

    grid = (M_pad // tm, N_pad // tn)

    # VMEM budget: double-buffered x / w / bias / out blocks, with headroom.
    elt = 4
    need = elt * 2 * (tm * K3 + K3 * tn + tn + tm * tn)
    vmem_limit = int(min(max(2 * need, 8 << 20), 48 << 20))

    out = pl.pallas_call(
        _conv1d_gemm_kernel,
        out_shape=jax.ShapeDtypeStruct((M_pad, N_pad), x.dtype),
        grid=grid,
        in_specs=[
            pl.BlockSpec((tm, K3), lambda i, j: (i, 0)),    # im2col rows (full contraction)
            pl.BlockSpec((K3, tn), lambda i, j: (0, j)),    # weight column tile
            pl.BlockSpec((1, tn), lambda i, j: (0, j)),     # bias column tile
        ],
        out_specs=pl.BlockSpec((tm, tn), lambda i, j: (i, j)),
        compiler_params=pltpu.CompilerParams(
            dimension_semantics=("parallel", "parallel"),
            vmem_limit_bytes=vmem_limit,
        ),
    )(xcol, w_mat, b_row)

    out = out[:M, :N].reshape(B, L_out, C)                   # drop row / channel padding
    return jnp.transpose(out, (0, 2, 1))                     # [B, C, L_out]


if __name__ == "__main__":
    key = jax.random.PRNGKey(0)
    kx, kw, kb = jax.random.split(key, 3)

    # small shapes consistent with the module: batch=2, dim(channels)=32, length=16
    B, C, L = 2, 32, 16
    x = jax.random.normal(kx, (B, C, L), dtype=jnp.float32)
    weight = jax.random.normal(kw, (C, C, 3), dtype=jnp.float32) * 0.1
    bias = jax.random.normal(kb, (C,), dtype=jnp.float32) * 0.1

    y = downsample1d(x, weight, bias)
    y = jax.block_until_ready(y)

    # reference: plain XLA strided conv1d
    ref = lax.conv_general_dilated(
        x, weight, window_strides=(2,), padding=((1, 1),),
        dimension_numbers=("NCH", "OIH", "NCH"),
    ) + bias[None, :, None]

    assert y.shape == ref.shape, (y.shape, ref.shape)
    assert jnp.allclose(y, ref, rtol=1e-5, atol=1e-5), float(jnp.max(jnp.abs(y - ref)))

    print("KERNEL_OK")
</pallas_src>

<mosaic_0001>
module attributes {stable_mosaic.version = 11 : i64} {
  func.func @_conv1d_gemm_kernel(%arg0: i32, %arg1: i32, %arg2: memref<16x96xf32, #tpu.memory_space<vmem>>, %arg3: memref<96x128xf32, #tpu.memory_space<vmem>>, %arg4: memref<1x128xf32, #tpu.memory_space<vmem>>, %arg5: memref<16x128xf32, #tpu.memory_space<vmem>>) attributes {dimension_semantics = [#tpu.dimension_semantics<parallel>, #tpu.dimension_semantics<parallel>], iteration_bounds = array<i64: 1, 1>, scalar_prefetch = 0 : i64, scratch_operands = 0 : i64, tpu.core_type = #tpu.core_type<tc>, window_params = [{transform_indices = @transform_0, window_bounds = array<i64: 16, 96>}, {transform_indices = @transform_1, window_bounds = array<i64: 96, 128>}, {transform_indices = @transform_2, window_bounds = array<i64: 1, 128>}, {transform_indices = @transform_3, window_bounds = array<i64: 16, 128>}]} {
    %c0 = arith.constant 0 : index
    %c0_0 = arith.constant 0 : index
    %0 = vector.load %arg2[%c0, %c0_0] : memref<16x96xf32, #tpu.memory_space<vmem>>, vector<16x96xf32>
    %c0_1 = arith.constant 0 : index
    %c0_2 = arith.constant 0 : index
    %1 = vector.load %arg3[%c0_1, %c0_2] : memref<96x128xf32, #tpu.memory_space<vmem>>, vector<96x128xf32>
    %cst = arith.constant dense<0.000000e+00> : vector<16x128xf32>
    %2 = tpu.matmul %0, %1, %cst {dimension_numbers = #tpu.dot_dimension_numbers<[1], [0], [0], [1], [0, 0, 1, 1], [], []>} : vector<16x96xf32>, vector<96x128xf32>, vector<16x128xf32> -> vector<16x128xf32>
    %c0_3 = arith.constant 0 : index
    %c0_4 = arith.constant 0 : index
    %3 = vector.load %arg4[%c0_3, %c0_4] : memref<1x128xf32, #tpu.memory_space<vmem>>, vector<1x128xf32>
    %4 = vector.broadcast %3 : vector<1x128xf32> to vector<16x128xf32>
    %5 = arith.addf %2, %4 : vector<16x128xf32>
    %c0_5 = arith.constant 0 : index
    %c0_6 = arith.constant 0 : index
    %6 = vector.load %arg5[%c0_5, %c0_6] : memref<16x128xf32, #tpu.memory_space<vmem>>, vector<16x128xf32>
    tpu.vector_store %arg5[%c0_5, %c0_6], %5 {strides = array<i32>} : memref<16x128xf32, #tpu.memory_space<vmem>>, vector<16x128xf32>,
    return
  }
  func.func @transform_0(%arg0: i32, %arg1: i32) -> (i32, i32) {
    %c0_i32 = arith.constant 0 : i32
    %c0_i32_0 = arith.constant 0 : i32
    return %arg0, %c0_i32 : i32, i32
  }
  func.func @transform_1(%arg0: i32, %arg1: i32) -> (i32, i32) {
    %c0_i32 = arith.constant 0 : i32
    %c0_i32_0 = arith.constant 0 : i32
    return %c0_i32, %arg1 : i32, i32
  }
  func.func @transform_2(%arg0: i32, %arg1: i32) -> (i32, i32) {
    %c0_i32 = arith.constant 0 : i32
    %c0_i32_0 = arith.constant 0 : i32
    return %c0_i32, %arg1 : i32, i32
  }
  func.func @transform_3(%arg0: i32, %arg1: i32) -> (i32, i32) {
    %c0_i32 = arith.constant 0 : i32
    return %arg0, %arg1 : i32, i32
  }
}

</mosaic_0001>

<bundles_post_ra>
// kernel: tpu_custom_call.1
= control target key start
LH: loop header
LB: loop body
LE: loop exit
PB: predicated region body
PF: predicated region fallthrough
CT: control target
= control target key end

     0   :  { %8 = vsyncpa [#allocation3], 0  ;;  %s329_s0 = inlined_call_operand.hbm [shape: f32[16,96], index: 0, kind: input, shape index: {}]   ;;  %s330_s1 = inlined_call_operand.hbm [shape: f32[96,128], index: 1, kind: input, shape index: {}]   ;;  %s331_s2 = inlined_call_operand.vmem [shape: f32[1,128], index: 2, kind: input, shape index: {}]   ;;  %s332_s3 = inlined_call_operand.hbm [shape: f32[16,128], index: 3, kind: output, shape index: {}]  }
   0x1   :  { %9 = vsyncpa [#allocation6], 0 }
   0x2   :  { %10 = vsyncpa [#allocation4], 0  ;;  %s281_s12 = smov [#allocation2]  }
   0x3   :  { %s16_s13 = sshll.u32 %s281_s12, 4  ;;  %s17_s13 = int_to_ptr.vmem [resolvable:$true] %s16_s13 }
   0x4   :  { %s223_s14 = scalar_lea.vmem %s17_s13, 256  ;;  %p228_p1 = scmp.lt.s32.totalorder %s17_s13, %s17_s13 }
   0x5   :  { %p224_p0 = scmp.ne.s32.totalorder %s17_s13, %s223_s14  ;;  %p229_p2 = scmp.lt.s32.totalorder %s223_s14, %s223_s14 }
   0x7   :  { %p230_p3 = por %p229_p2, %p228_p1 }
   0x9   :  { %p231_p4 = pnand %p230_p3, %p224_p0 }
   0xb   :  { %234 = shalt.err (!%p231_p4)
}
   0xc   :  { %s282_s15 = smov 128   ;;  %s283_s16 = smov 8  }
   0xd   :  { %22 = dma.hbm_to_vmem [thread:$0]  %s329_s0, 256, %s17_s13, [#allocation3], %s282_s15, %s282_s15, %s283_s16  }
   0xe   :  { %s284_s19 = smov [#allocation5]  }
   0xf   :  { %s28_s20 = sshll.u32 %s284_s19, 4  ;;  %s29_s20 = int_to_ptr.vmem [resolvable:$true] %s28_s20 }
  0x10   :  { %s243_s21 = scalar_lea.vmem %s29_s20, 1536  ;;  %p248_p6 = scmp.lt.s32.totalorder %s29_s20, %s29_s20 }
  0x11   :  { %p244_p5 = scmp.ne.s32.totalorder %s29_s20, %s243_s21  ;;  %p249_p7 = scmp.lt.s32.totalorder %s243_s21, %s243_s21 }
  0x13   :  { %p250_p8 = por %p249_p7, %p248_p6 }
  0x15   :  { %p251_p9 = pnand %p250_p8, %p244_p5 }
  0x17   :  { %254 = shalt.err (!%p251_p9)
}
  0x18   :  { %34 = dma.hbm_to_vmem [thread:$0]  %s330_s1, 1536, %s29_s20, [#allocation6], %s282_s15, %s282_s15, %s283_s16  }
  0x19   :  { %275 = dma.done.wait [#allocation3], 256  }
  0x1a   :  { %276 = vsyncadd [#allocation3], 4294967040 }
  0x1b   :  { %277 = dma.done.wait [#allocation6], 1536  }
  0x1c   :  { %278 = vsyncadd [#allocation6], 4294965760  ;;  %v56_v0 = vld [vmem:[#allocation5 + $0x58] sm:$0xff]  ;;  %v55_v1 = vld [vmem:[#allocation5 + $0x50] sm:$0xff]  ;;  %vm64_vm0 = vcmask 785408   ;;  %s285_s24 = smov [#allocation7]  }
  0x1d   :  { %183 = vmatprep.subr.mxu0 %v56_v0  ;;  %v54_v2 = vld [vmem:[#allocation5 + $0x48] sm:$0xff]  ;;  %v53_v3 = vld [vmem:[#allocation5 + $0x40] sm:$0xff]  ;;  %v43_v4 = vld [vmem:[#allocation2] sm:$0xff]  ;;  %s153_s25 = sshll.u32 %s285_s24, 4  ;;  %s154_s25 = int_to_ptr.vmem [resolvable:$true] %s153_s25 }
  0x1e   :  { %184 = vmatpush3.msra.mxu0 %v56_v0  ;;  %207 = vmatprep.mubr.msk.f32.mxu0 %vm64_vm0, %v43_v4  ;;  %v52_v5 = vld [vmem:[#allocation5 + $0x38] sm:$0xff]  ;;  %v51_v6 = vld [vmem:[#allocation5 + $0x30] sm:$0xff]  ;;  %v50_v7 = vld [vmem:[#allocation5 + $0x28] sm:$0xff]  ;;  %s255_s26 = scalar_lea.vmem %s154_s25, 256  ;;  %p260_p11 = scmp.lt.s32.totalorder %s154_s25, %s154_s25 }
  0x1f   :  { %185 = vmatprep.subr.mxu0 %v55_v1  ;;  %v49_v8 = vld [vmem:[#allocation5 + $0x20] sm:$0xff]  ;;  %v48_v9 = vld [vmem:[#allocation5 + $0x18] sm:$0xff]  ;;  %v47_v10 = vld [vmem:[#allocation5 + $0x10] sm:$0xff]  ;;  %p256_p10 = scmp.ne.s32.totalorder %s154_s25, %s255_s26  ;;  %p261_p12 = scmp.lt.s32.totalorder %s255_s26, %s255_s26 }
  0x20   :  { %186 = vmatpush3.msra.mxu0 %v55_v1  ;;  %v46_v11 = vld [vmem:[#allocation5 + $0x8] sm:$0xff]  ;;  %v45_v12 = vld [vmem:[#allocation5] sm:$0xff]  ;;  %v44_v13 = vld [vmem:[#allocation2 + $0x8] sm:$0xff] }
  0x21   :  { %187 = vmatprep.subr.mxu0 %v54_v2  ;;  %v166_v14 = vld [vmem:[%s331_s2] ss:$0 sm:$0xff]  ;;  %p262_p13 = por %p261_p12, %p260_p11 }
  0x22   :  { %188 = vmatpush3.msra.mxu0 %v54_v2 }
  0x23   :  { %189 = vmatprep.subr.mxu0 %v53_v3  ;;  %p263_p0 = pnand %p262_p13, %p256_p10 }
  0x24   :  { %190 = vmatpush3.msra.mxu0 %v53_v3 }
  0x25   :  { %191 = vmatprep.subr.mxu0 %v52_v5 }
  0x26   :  { %192 = vmatpush3.msra.mxu0 %v52_v5 }
  0x27   :  { %193 = vmatprep.subr.mxu0 %v51_v6 }
  0x28   :  { %194 = vmatpush3.msra.mxu0 %v51_v6 }
  0x29   :  { %195 = vmatprep.subr.mxu0 %v50_v7 }
  0x2a   :  { %196 = vmatpush3.msra.mxu0 %v50_v7 }
  0x2b   :  { %197 = vmatprep.subr.mxu0 %v49_v8 }
  0x2c   :  { %198 = vmatpush3.msra.mxu0 %v49_v8 }
  0x2d   :  { %199 = vmatprep.subr.mxu0 %v48_v9 }
  0x2e   :  { %200 = vmatpush3.msra.mxu0 %v48_v9 }
  0x2f   :  { %201 = vmatprep.subr.mxu0 %v47_v10 }
  0x30   :  { %202 = vmatpush3.msra.mxu0 %v47_v10 }
  0x31   :  { %203 = vmatprep.subr.mxu0 %v46_v11 }
  0x32   :  { %204 = vmatpush3.msra.mxu0 %v46_v11 }
  0x33   :  { %205 = vmatprep.subr.mxu0 %v45_v12 }
  0x34   :  { %206 = vmatpush3.msra.mxu0 %v45_v12 }
  0x35   :  { %208 = vmatmul.mubr.msk.f32.vlgmr.msra.gmra.mxu0 %vm64_vm0, %v44_v13 }
  0xf5   :  { %v209_v15 = vpop.f32.mrf.mxu0 }
  0xf6   :  { %v143_v16 = vadd.f32 %v209_v15, %v166_v14 }
  0xf7   :  { %v137_v17 = vpop.f32.mrf.mxu0 }
  0xf8   :  { %147 = vst [vmem:[#allocation7 + $0x8] sm:$0xff] %v143_v16  ;;  %v138_v18 = vadd.f32 %v166_v14, %v137_v17 }
  0xfa   :  { %146 = vst [vmem:[#allocation7] sm:$0xff] %v138_v18 }
  0xfb   :  { %266 = shalt.err (!%p263_p0)
}
  0xfc   :  { %159 = dma.vmem_to_hbm [thread:$0]  %s154_s25, 256, %s332_s3, [#allocation4], %s282_s15, %s282_s15, %s283_s16  }
  0xfd   :  { %279 = dma.done.wait [#allocation4], 256  }
  0xfe   :  { %280 = vsyncadd [#allocation4], 4294967040 }
  0xff   :  { %163 = vsyncpa [#allocation3], 1 }
 0x100   :  { %164 = vsyncpa [#allocation6], 1 }
 0x101   :  { %165 = vsyncpa [#allocation4], 1 }

</bundles_post_ra>
